<compile_context>
chip_gen: v6e
topology: v6e:2x2x1
jax: 0.10.0
libtpu: 0.0.40
codegen_flags: <defaults>
</compile_context>

<pallas_src>
import functools

import jax
import jax.numpy as jnp
from jax import lax
from jax.experimental import pallas as pl
from jax.experimental.pallas import tpu as pltpu


UPPER_BOUND = 50.0   # MLPMultiplier.Config.upper_bound


def _round_up(x, m):
    return ((x + m - 1) // m) * m


def _mlp_multiplier_kernel(state_ref, qc_ref, w1s_ref, w1q_ref, b1_ref,
                           w2_ref, b2_ref, w3r_ref, b3_ref, out_ref,
                           *, upper_bound, compute_dtype):
    """Full forward for one batch tile.

    state_ref : (TB, S)   f32
    qc_ref    : (TB, 1)   f32
    w1s_ref   : (S, H)    w1q_ref : (1, H)   (split of the (S+1, H) layer-1 W)
    b1_ref    : (1, H)    w2_ref  : (H, H)   b2_ref : (1, H)
    w3r_ref   : (1, H)    output head as a row
    b3_ref    : (1, 1)    scalar, lives in SMEM
    out_ref   : (1, TB)   lam with batch on the lane axis (lane-dense store)
    """
    f32 = jnp.float32
    x = state_ref[...].astype(compute_dtype)                        # (TB, S)

    # Layer 1 with the torch.cat([state, Qc], -1) folded in.
    z1 = jnp.dot(x, w1s_ref[...], preferred_element_type=f32)       # (TB, H) f32
    z1 = z1 + qc_ref[...] * w1q_ref[...].astype(f32) + b1_ref[...]
    h1 = jnp.tanh(z1.astype(compute_dtype))                         # (TB, H)

    # Layer 2.
    z2 = jnp.dot(h1, w2_ref[...], preferred_element_type=f32) + b2_ref[...]
    h2 = jnp.tanh(z2.astype(compute_dtype))                         # (TB, H)

    # Layer 3 (out_features = 1): contract H of (1,H) x (TB,H) -> (1, TB),
    # i.e. the result is already lane-dense for the store.
    y = lax.dot_general(w3r_ref[...], h2, (((1,), (1,)), ((), ())),
                        preferred_element_type=f32)                 # (1, TB)
    y = y + b3_ref[0, 0]

    # lam = UB/2 * (1 + tanh(2*y/UB)), computed in f32.
    lam = (0.5 * upper_bound) * (1.0 + jnp.tanh(y * (2.0 / upper_bound)))
    out_ref[...] = lam.astype(out_ref.dtype)


def mlp_multiplier_forward(state, qc, params, *, upper_bound=UPPER_BOUND,
                           batch_tile=None, compute_dtype=jnp.float32):
    """state: (B, S) f32, qc: (B,) f32 -> lam: (B,) f32.

    compute_dtype: jnp.float32 (default; use on v5e) or jnp.bfloat16
    (recommended for the matmul/tanh path on v6e / v7x). Accumulation and the
    final squash always stay in f32.
    """
    w1, b1, w2, b2, w3, b3 = params
    B, S = state.shape
    H = w1.shape[1]
    assert w1.shape == (S + 1, H)

    # --- tiling -----------------------------------------------------------
    if batch_tile is None:
        batch_tile = min(1024, _round_up(B, 128))
    assert batch_tile % 128 == 0, "batch_tile must be a multiple of 128 lanes"
    b_pad = _round_up(B, batch_tile)
    if b_pad != B:                      # tail handling: zero-pad, slice at end
        state = jnp.pad(state, ((0, b_pad - B), (0, 0)))
        qc = jnp.pad(qc, ((0, b_pad - B),))
    num_tiles = b_pad // batch_tile     # keep >=2 tiles on v7x for both TCs

    # --- parameter plumbing (tiny one-off XLA ops on weights only) ---------
    state = state.astype(jnp.float32)
    qc2 = qc.astype(jnp.float32).reshape(b_pad, 1)
    w1s = w1[:S, :]                     # (S, H) state part of layer 1
    w1q = w1[S:S + 1, :]                # (1, H) Qc column of layer 1
    w3r = jnp.reshape(w3, (1, H))       # (1, H) output head as a row
    b3s = jnp.reshape(b3, (1, 1)).astype(jnp.float32)
    if compute_dtype != jnp.float32:    # halve weight VMEM/HBM traffic
        w1s, w1q, w2, w3r = (t.astype(compute_dtype)
                             for t in (w1s, w1q, w2, w3r))
    b1 = b1.astype(jnp.float32)
    b2 = b2.astype(jnp.float32)

    kernel = functools.partial(_mlp_multiplier_kernel,
                               upper_bound=float(upper_bound),
                               compute_dtype=compute_dtype)

    flops = 2 * b_pad * (S * H + H * H + H)
    transcendentals = b_pad * (2 * H + 1)
    bytes_accessed = (state.size * state.dtype.itemsize
                      + qc2.size * 4 + b_pad * 4
                      + sum(int(t.size) * t.dtype.itemsize
                            for t in (w1s, w1q, b1, w2, b2, w3r, b3s)))

    out = pl.pallas_call(
        kernel,
        out_shape=jax.ShapeDtypeStruct((1, b_pad), jnp.float32),
        grid_spec=pltpu.PrefetchScalarGridSpec(
            num_scalar_prefetch=0,
            grid=(num_tiles,),
            in_specs=[
                # per-step batch tile of the (un-augmented) state and of Qc
                pl.BlockSpec((batch_tile, S), lambda i: (i, 0)),
                pl.BlockSpec((batch_tile, 1), lambda i: (i, 0)),
                # weights / biases: full arrays, VMEM-resident for every tile
                pl.BlockSpec((S, H), lambda i: (0, 0)),
                pl.BlockSpec((1, H), lambda i: (0, 0)),
                pl.BlockSpec((1, H), lambda i: (0, 0)),
                pl.BlockSpec((H, H), lambda i: (0, 0)),
                pl.BlockSpec((1, H), lambda i: (0, 0)),
                pl.BlockSpec((1, H), lambda i: (0, 0)),
                # scalar output bias: SMEM (a (1,1) VMEM block would pad to a
                # full (8,128) tile + DMA)
                pl.BlockSpec(memory_space=pltpu.MemorySpace.SMEM),
            ],
            # lane-dense output: batch sits on the 128-lane axis
            out_specs=pl.BlockSpec((1, batch_tile), lambda i: (0, i)),
        ),
        compiler_params=pltpu.CompilerParams(
            dimension_semantics=("parallel",)),
        cost_estimate=pl.CostEstimate(flops=flops,
                                      transcendentals=transcendentals,
                                      bytes_accessed=bytes_accessed),
    )(state, qc2, w1s, w1q, b1, w2, b2, w3r, b3s)

    # squeeze_output=True in the torch mlp() helper -> shape (B,)
    return out[0, :B]


def init_params(key, state_dim, hidden_dim):
    """Deterministic synthetic init matching nn.Linear shapes of
    mlp([state_dim+1, hidden_dim, hidden_dim, 1])."""
    d_in = state_dim + 1
    k1, k2, k3 = jax.random.split(key, 3)

    def linear(k, fan_in, fan_out):
        bound = 1.0 / jnp.sqrt(fan_in)
        kw, kb = jax.random.split(k)
        w = jax.random.uniform(kw, (fan_in, fan_out), jnp.float32, -bound, bound)
        b = jax.random.uniform(kb, (1, fan_out), jnp.float32, -bound, bound)
        return w, b

    w1, b1 = linear(k1, d_in, hidden_dim)
    w2, b2 = linear(k2, hidden_dim, hidden_dim)
    w3, b3 = linear(k3, hidden_dim, 1)
    return (w1, b1, w2, b2, w3, b3)


def reference_forward(state, qc, params, *, upper_bound=UPPER_BOUND):
    """Pure-JAX f32 reference (mirrors the PyTorch module)."""
    w1, b1, w2, b2, w3, b3 = params
    x = jnp.concatenate([state, qc[:, None]], axis=-1)
    h = jnp.tanh(x @ w1 + b1)
    h = jnp.tanh(h @ w2 + b2)
    y = (h @ w3 + b3)[:, 0]
    return upper_bound / 2.0 * (1.0 + jnp.tanh(y / upper_bound * 2.0))


if __name__ == "__main__":
    key = jax.random.PRNGKey(0)
    k_state, k_qc, k_params = jax.random.split(key, 3)

    batch = 200             # deliberately NOT a multiple of the 128-row tile
    state_dim = 15          # -> augmented input dim 16
    hidden_dim = 128        # lane-width hidden dim (real Config.hidden_dim=256)

    state = jax.random.normal(k_state, (batch, state_dim), jnp.float32)
    qc = jax.random.normal(k_qc, (batch,), jnp.float32)
    params = init_params(k_params, state_dim, hidden_dim)

    lam_ref = reference_forward(state, qc, params)

    # f32 path (v5e-friendly); 2 parallel grid steps exercise multi-tile + pad.
    lam = mlp_multiplier_forward(state, qc, params, batch_tile=128)
    lam = jax.block_until_ready(lam)
    assert lam.shape == (batch,)
    assert jnp.allclose(lam, lam_ref, atol=1e-4, rtol=1e-4), (lam, lam_ref)

    # bf16 compute path (recommended on v6e / v7x); f32 accumulation inside.
    lam_bf16 = mlp_multiplier_forward(state, qc, params, batch_tile=128,
                                      compute_dtype=jnp.bfloat16)
    lam_bf16 = jax.block_until_ready(lam_bf16)
    assert lam_bf16.shape == (batch,)
    assert jnp.allclose(lam_bf16, lam_ref, atol=0.5, rtol=0.05)

    print("KERNEL_OK")
</pallas_src>

<mosaic_0001>
module attributes {stable_mosaic.version = 11 : i64} {
  func.func @_mlp_multiplier_kernel(%arg0: i32, %arg1: memref<128x15xf32, #tpu.memory_space<vmem>>, %arg2: memref<128x1xf32, #tpu.memory_space<vmem>>, %arg3: memref<15x128xf32, #tpu.memory_space<vmem>>, %arg4: memref<1x128xf32, #tpu.memory_space<vmem>>, %arg5: memref<1x128xf32, #tpu.memory_space<vmem>>, %arg6: memref<128x128xf32, #tpu.memory_space<vmem>>, %arg7: memref<1x128xf32, #tpu.memory_space<vmem>>, %arg8: memref<1x128xf32, #tpu.memory_space<vmem>>, %arg9: memref<1x1xf32, #tpu.memory_space<smem>>, %arg10: memref<1x128xf32, #tpu.memory_space<vmem>>) attributes {dimension_semantics = [#tpu.dimension_semantics<parallel>], iteration_bounds = array<i64: 2>, scalar_prefetch = 0 : i64, scratch_operands = 0 : i64, tpu.core_type = #tpu.core_type<tc>, window_params = [{transform_indices = @transform_0, window_bounds = array<i64: 128, 15>}, {transform_indices = @transform_1, window_bounds = array<i64: 128, 1>}, {pipeline_mode = #tpu.pipeline_mode<synchronous>, transform_indices = @transform_2, window_bounds = array<i64: 15, 128>}, {pipeline_mode = #tpu.pipeline_mode<synchronous>, transform_indices = @transform_3, window_bounds = array<i64: 1, 128>}, {pipeline_mode = #tpu.pipeline_mode<synchronous>, transform_indices = @transform_4, window_bounds = array<i64: 1, 128>}, {pipeline_mode = #tpu.pipeline_mode<synchronous>, transform_indices = @transform_5, window_bounds = array<i64: 128, 128>}, {pipeline_mode = #tpu.pipeline_mode<synchronous>, transform_indices = @transform_6, window_bounds = array<i64: 1, 128>}, {pipeline_mode = #tpu.pipeline_mode<synchronous>, transform_indices = @transform_7, window_bounds = array<i64: 1, 128>}, {transform_indices = @transform_8, window_bounds = array<i64: 1, 1>}, {transform_indices = @transform_9, window_bounds = array<i64: 1, 128>}]} {
    %c0 = arith.constant 0 : index
    %c0_0 = arith.constant 0 : index
    %0 = vector.load %arg1[%c0, %c0_0] : memref<128x15xf32, #tpu.memory_space<vmem>>, vector<128x15xf32>
    %c0_1 = arith.constant 0 : index
    %c0_2 = arith.constant 0 : index
    %1 = vector.load %arg3[%c0_1, %c0_2] : memref<15x128xf32, #tpu.memory_space<vmem>>, vector<15x128xf32>
    %cst = arith.constant dense<0.000000e+00> : vector<128x128xf32>
    %2 = tpu.matmul %0, %1, %cst {dimension_numbers = #tpu.dot_dimension_numbers<[1], [0], [0], [1], [0, 0, 1, 1], [], []>} : vector<128x15xf32>, vector<15x128xf32>, vector<128x128xf32> -> vector<128x128xf32>
    %c0_3 = arith.constant 0 : index
    %c0_4 = arith.constant 0 : index
    %3 = vector.load %arg2[%c0_3, %c0_4] : memref<128x1xf32, #tpu.memory_space<vmem>>, vector<128x1xf32>
    %c0_5 = arith.constant 0 : index
    %c0_6 = arith.constant 0 : index
    %4 = vector.load %arg4[%c0_5, %c0_6] : memref<1x128xf32, #tpu.memory_space<vmem>>, vector<1x128xf32>
    %5 = vector.broadcast %3 : vector<128x1xf32> to vector<128x128xf32>
    %6 = vector.broadcast %4 : vector<1x128xf32> to vector<128x128xf32>
    %7 = arith.mulf %5, %6 : vector<128x128xf32>
    %8 = arith.addf %2, %7 : vector<128x128xf32>
    %c0_7 = arith.constant 0 : index
    %c0_8 = arith.constant 0 : index
    %9 = vector.load %arg5[%c0_7, %c0_8] : memref<1x128xf32, #tpu.memory_space<vmem>>, vector<1x128xf32>
    %10 = vector.broadcast %9 : vector<1x128xf32> to vector<128x128xf32>
    %11 = arith.addf %8, %10 : vector<128x128xf32>
    %12 = math.tanh %11 : vector<128x128xf32>
    %c0_9 = arith.constant 0 : index
    %c0_10 = arith.constant 0 : index
    %13 = vector.load %arg6[%c0_9, %c0_10] : memref<128x128xf32, #tpu.memory_space<vmem>>, vector<128x128xf32>
    %cst_11 = arith.constant dense<0.000000e+00> : vector<128x128xf32>
    %14 = tpu.matmul %12, %13, %cst_11 {dimension_numbers = #tpu.dot_dimension_numbers<[1], [0], [0], [1], [0, 0, 1, 1], [], []>} : vector<128x128xf32>, vector<128x128xf32>, vector<128x128xf32> -> vector<128x128xf32>
    %c0_12 = arith.constant 0 : index
    %c0_13 = arith.constant 0 : index
    %15 = vector.load %arg7[%c0_12, %c0_13] : memref<1x128xf32, #tpu.memory_space<vmem>>, vector<1x128xf32>
    %16 = vector.broadcast %15 : vector<1x128xf32> to vector<128x128xf32>
    %17 = arith.addf %14, %16 : vector<128x128xf32>
    %18 = math.tanh %17 : vector<128x128xf32>
    %c0_14 = arith.constant 0 : index
    %c0_15 = arith.constant 0 : index
    %19 = vector.load %arg8[%c0_14, %c0_15] : memref<1x128xf32, #tpu.memory_space<vmem>>, vector<1x128xf32>
    %cst_16 = arith.constant dense<0.000000e+00> : vector<1x128xf32>
    %20 = tpu.matmul %19, %18, %cst_16 {dimension_numbers = #tpu.dot_dimension_numbers<[1], [1], [0], [0], [0, 0, 1, 0], [], []>} : vector<1x128xf32>, vector<128x128xf32>, vector<1x128xf32> -> vector<1x128xf32>
    %c0_17 = arith.constant 0 : index
    %c0_18 = arith.constant 0 : index
    %21 = memref.load %arg9[%c0_17, %c0_18] : memref<1x1xf32, #tpu.memory_space<smem>>
    %22 = vector.broadcast %21 : f32 to vector<1x128xf32>
    %23 = arith.addf %20, %22 : vector<1x128xf32>
    %cst_19 = arith.constant 4.000000e-02 : f32
    %24 = vector.broadcast %cst_19 : f32 to vector<1x128xf32>
    %25 = arith.mulf %23, %24 : vector<1x128xf32>
    %26 = math.tanh %25 : vector<1x128xf32>
    %cst_20 = arith.constant 1.000000e+00 : f32
    %27 = vector.broadcast %cst_20 : f32 to vector<1x128xf32>
    %28 = arith.addf %27, %26 : vector<1x128xf32>
    %cst_21 = arith.constant 2.500000e+01 : f32
    %29 = vector.broadcast %cst_21 : f32 to vector<1x128xf32>
    %30 = arith.mulf %29, %28 : vector<1x128xf32>
    %c0_22 = arith.constant 0 : index
    %c0_23 = arith.constant 0 : index
    %31 = vector.load %arg10[%c0_22, %c0_23] : memref<1x128xf32, #tpu.memory_space<vmem>>, vector<1x128xf32>
    tpu.vector_store %arg10[%c0_22, %c0_23], %30 {strides = array<i32>} : memref<1x128xf32, #tpu.memory_space<vmem>>, vector<1x128xf32>,
    return
  }
  func.func @transform_0(%arg0: i32) -> (i32, i32) {
    %c0_i32 = arith.constant 0 : i32
    %c0_i32_0 = arith.constant 0 : i32
    return %arg0, %c0_i32 : i32, i32
  }
  func.func @transform_1(%arg0: i32) -> (i32, i32) {
    %c0_i32 = arith.constant 0 : i32
    %c0_i32_0 = arith.constant 0 : i32
    return %arg0, %c0_i32 : i32, i32
  }
  func.func @transform_2(%arg0: i32) -> (i32, i32) {
    %c0_i32 = arith.constant 0 : i32
    %c0_i32_0 = arith.constant 0 : i32
    %c0_i32_1 = arith.constant 0 : i32
    return %c0_i32, %c0_i32_0 : i32, i32
  }
  func.func @transform_3(%arg0: i32) -> (i32, i32) {
    %c0_i32 = arith.constant 0 : i32
    %c0_i32_0 = arith.constant 0 : i32
    %c0_i32_1 = arith.constant 0 : i32
    return %c0_i32, %c0_i32_0 : i32, i32
  }
  func.func @transform_4(%arg0: i32) -> (i32, i32) {
    %c0_i32 = arith.constant 0 : i32
    %c0_i32_0 = arith.constant 0 : i32
    %c0_i32_1 = arith.constant 0 : i32
    return %c0_i32, %c0_i32_0 : i32, i32
  }
  func.func @transform_5(%arg0: i32) -> (i32, i32) {
    %c0_i32 = arith.constant 0 : i32
    %c0_i32_0 = arith.constant 0 : i32
    %c0_i32_1 = arith.constant 0 : i32
    return %c0_i32, %c0_i32_0 : i32, i32
  }
  func.func @transform_6(%arg0: i32) -> (i32, i32) {
    %c0_i32 = arith.constant 0 : i32
    %c0_i32_0 = arith.constant 0 : i32
    %c0_i32_1 = arith.constant 0 : i32
    return %c0_i32, %c0_i32_0 : i32, i32
  }
  func.func @transform_7(%arg0: i32) -> (i32, i32) {
    %c0_i32 = arith.constant 0 : i32
    %c0_i32_0 = arith.constant 0 : i32
    %c0_i32_1 = arith.constant 0 : i32
    return %c0_i32, %c0_i32_0 : i32, i32
  }
  func.func @transform_8(%arg0: i32) -> (i32, i32) {
    %c0_i32 = arith.constant 0 : i32
    %c0_i32_0 = arith.constant 0 : i32
    %c0_i32_1 = arith.constant 0 : i32
    return %c0_i32, %c0_i32_0 : i32, i32
  }
  func.func @transform_9(%arg0: i32) -> (i32, i32) {
    %c0_i32 = arith.constant 0 : i32
    %c0_i32_0 = arith.constant 0 : i32
    return %c0_i32, %arg0 : i32, i32
  }
}

</mosaic_0001>

<bundles_post_ra>
// kernel: tpu_custom_call.1
= control target key start
LH: loop header
LB: loop body
LE: loop exit
PB: predicated region body
PF: predicated region fallthrough
CT: control target
= control target key end

     0   :  { %s1804_s0 = inlined_call_operand.vmem [shape: f32[256,15], index: 0, kind: input, shape index: {}]   ;;  %s1805_s1 = inlined_call_operand.vmem [shape: f32[256,1], index: 1, kind: input, shape index: {}]   ;;  %s1806_s2 = inlined_call_operand.vmem [shape: f32[15,128], index: 2, kind: input, shape index: {}]   ;;  %s1807_s3 = inlined_call_operand.vmem [shape: f32[1,128], index: 3, kind: input, shape index: {}]   ;;  %s1808_s4 = inlined_call_operand.vmem [shape: f32[1,128], index: 4, kind: input, shape index: {}]   ;;  %s1809_s5 = inlined_call_operand.vmem [shape: f32[128,128], index: 5, kind: input, shape index: {}]   ;;  %s1810_s6 = inlined_call_operand.vmem [shape: f32[1,128], index: 6, kind: input, shape index: {}]   ;;  %s1811_s7 = inlined_call_operand.vmem [shape: f32[1,128], index: 7, kind: input, shape index: {}]   ;;  %s1812_s8 = inlined_call_operand.<no memory space> [shape: f32[1,1], index: 8, kind: input, shape index: {}]   ;;  %s1813_s9 = inlined_call_operand.hbm [shape: f32[1,256], index: 9, kind: output, shape index: {}]  }
   0x1   :  { %14 = sst [smem:[#allocation2]] %s1812_s8 }
   0x2   :  { %15 = vsyncpa [#allocation4], 0 }
   0x3   :  { %17 = vsyncpa [#allocation4 + $0x1], 0  ;;  %s1517_s11 = smov 0   ;;  %s1519_s12 = smov 0  }
   0x4   :  { %s1521_s13 = smov 0   ;;  %s1523_s14 = smov 0  }
   0x5 LB: > { %s1070_s8 = sadd.s32 4294967295, %s1458_s14   ;;  %s1071_s15 = sadd.s32 4294967294, %s1458_s14   ;;  %s1458_s14 = sphi %s1523_s14, %s1819_s14   ;;  %s1454_s13 = sphi %s1521_s13, %s1818_s13   ;;  %s1450_s12 = sphi %s1519_s12, %s1817_s12   ;;  %s1446_s11 = sphi %s1517_s11, %s1816_s11  }
   0x6   : > { %s1540_s16 = sadd.s32 1, %s1458_s14   ;;  %s229_s17 = sadd.s32 1, %s1454_s13 }
   0x7   : > { %s226_s18 = ssub.s32 %s1458_s14, %s1540_s16  ;;  %p239_p0 = scmp.ne.s32.totalorder %s1454_s13, %s1450_s12 }
   0x8   : > { %p227_p1 = scmp.eq.s32.totalorder %s226_s18, 0  ;;  %p240_p2 = scmp.eq.s32.totalorder %s1070_s8, 1 }
   0x9   : > { %p245_p3 = scmp.ne.s32.totalorder %s1450_s12, %s1446_s11  ;;  %p246_p4 = scmp.eq.s32.totalorder %s1071_s15, 1 }
   0xa   : > { %s1550_s19 = scalar_select %p227_p1, %s1454_s13, %s229_s17  }
   0xb   : > { %p1552_p5 = por %p240_p2, %p239_p0  ;;  %p1556_p6 = por %p246_p4, %p245_p3 }
   0xc   : > { %p1074_p7 = scmp.ge.s32.totalorder %s1458_s14, 1  ;;  %p303_p8 = scmp.lt.s32.totalorder %s1458_s14, 3 }
   0xe   : > { %p304_p9 = pnand %p1074_p7, %p303_p8 }
   0xf   : > { %s1568_s26 = sshll.u32 (!%p304_p9), %s1070_s8, 4  ;;  %s914_s23 = sld [smem:[#allocation2]] (!%p304_p9) }
  0x10   : > { %307 = sbr.rel (%p304_p9) target bundleno = 769 (0x301), region = 56  ;;  %p344_p10 = scmp.lt.s32.totalorder (!%p304_p9), %s1568_s26, 31 }
  0x11   : > { %s341_s24 = sand.u32 (!%p304_p9), 1, %s1450_s12   ;;  %s1002_s29 = scalar_lea.hbm (!%p304_p9), %s1813_s9, %s1568_s26 }
  0x12   : > { %s992_s30 = scalar_lea.sflag (!%p304_p9), [#allocation4], %s341_s24 }
  0x15   : > { %v372_v0 = vld [vmem:[%s1806_s2 + $0x8] sm:$0x7f]  ;;  %vm541_vm0 = vcmask 1046528   ;;  %v371_v1 = vld [vmem:[%s1806_s2] sm:$0xff]  ;;  %v1460_v2 = vmov 0   ;;  %s345_s27 = scalar_select %p344_p10, %s1568_s26, 31 }
  0x16   : > { %1169 = vmatprep.subr.msk.mxu1 %vm541_vm0, %v372_v0  ;;  %1330 = vset.pattern.permute.xlu0 %v1460_v2  ;;  %vm492_vm1 = vcmask 121856   ;;  %v744_v22 = vld [vmem:[%s1809_s5 + $0x78] sm:$0xff]  ;;  %v743_v27 = vld [vmem:[%s1809_s5 + $0x70] sm:$0xff]  ;;  %v742_v32 = vld [vmem:[%s1809_s5 + $0x68] sm:$0xff]  ;;  %vm1462_vm2 = vmmov 0  }
  0x17   : > { %1170 = vmatpush3.msk.msra.mxu1 %vm541_vm0, %v372_v0  ;;  %1331 = vset.pattern.permute.xlu1 %v1460_v2  ;;  %s1076_s28 = sshll.u32 %s345_s27, 3  ;;  %v741_v36 = vld [vmem:[%s1809_s5 + $0x60] sm:$0xff]  ;;  %v740_v37 = vld [vmem:[%s1809_s5 + $0x58] sm:$0xff]  ;;  %v739_v40 = vld [vmem:[%s1809_s5 + $0x50] sm:$0xff] }
  0x18   : > { %1171 = vmatprep.subr.mxu1 %v371_v1  ;;  %s1575_s10 = scalar_lea.vmem %s1804_s0, %s1076_s28  ;;  %s1585_s17 = scalar_lea.vmem %s1805_s1, %s1076_s28  ;;  %v738_v41 = vld [vmem:[%s1809_s5 + $0x48] sm:$0xff]  ;;  %v737_v42 = vld [vmem:[%s1809_s5 + $0x40] sm:$0xff]  ;;  %v736_v43 = vld [vmem:[%s1809_s5 + $0x38] sm:$0xff] }
  0x19   : > { %1172 = vmatpush3.msra.mxu1 %v371_v1  ;;  %v355_v3 = vld [vmem:[%s1575_s10] sm:$0xff]  ;;  %v356_v4 = vld [vmem:[%s1575_s10 + $0x8] sm:$0xff]  ;;  %v357_v5 = vld [vmem:[%s1575_s10 + $0x10] sm:$0xff] }
  0x1a   : > { %1173 = vmatprep.mubr.msk.f32.mxu1 %vm492_vm1, %v355_v3  ;;  %v358_v6 = vld [vmem:[%s1575_s10 + $0x18] sm:$0xff]  ;;  %v359_v7 = vld [vmem:[%s1575_s10 + $0x20] sm:$0xff]  ;;  %v375_v9 = vld [vmem:[%s1585_s17 + $0x10] sm:$0xff]  ;;  %1197 = vmatprep.subr.mxu1 %v744_v22 }
  0x1b   : > { %1174 = vmatmul.mubr.msk.f32.vlgmr.msra.gmra.mxu1 %vm492_vm1, %v356_v4  ;;  %v373_v8 = vld [vmem:[%s1585_s17] sm:$0xff]  ;;  %v360_v10 = vld [vmem:[%s1575_s10 + $0x28] sm:$0xff]  ;;  %402 = vperm.xlu1 %1331, %v375_v9   ;;  %v361_v12 = vld [vmem:[%s1575_s10 + $0x30] sm:$0xff] }
  0x1c   : > { %1176 = vmatprep.mubr.msk.f32.mxu1 %vm492_vm1, %v357_v5  ;;  %392 = vperm.xlu0 %1330, %v373_v8   ;;  %v374_v11 = vld [vmem:[%s1585_s17 + $0x8] sm:$0xff]  ;;  %v376_v13 = vld [vmem:[%s1585_s17 + $0x18] sm:$0xff]  ;;  %v377_v15 = vld [vmem:[%s1585_s17 + $0x20] sm:$0xff] }
  0x1d   : > { %v362_v14 = vld [vmem:[%s1575_s10 + $0x38] sm:$0xff]  ;;  %v363_v16 = vld [vmem:[%s1575_s10 + $0x40] sm:$0xff]  ;;  %v378_v17 = vld [vmem:[%s1585_s17 + $0x28] sm:$0xff]  ;;  %1198 = vmatpush3.msra.mxu1 %v744_v22 }
  0x1e   : > { %v364_v18 = vld [vmem:[%s1575_s10 + $0x48] sm:$0xff]  ;;  %v379_v19 = vld [vmem:[%s1585_s17 + $0x30] sm:$0xff]  ;;  %v380_v21 = vld [vmem:[%s1585_s17 + $0x38] sm:$0xff]  ;;  %1199 = vmatprep.subr.mxu1 %v743_v27 }
  0x1f   : > { %1177 = vmatmul.mubr.msk.f32.gmra.mxu1 %vm492_vm1, %v358_v6  ;;  %407 = vperm.xlu1 %1331, %v376_v13   ;;  %v365_v20 = vld [vmem:[%s1575_s10 + $0x50] sm:$0xff]  ;;  %v366_v23 = vld [vmem:[%s1575_s10 + $0x58] sm:$0xff]  ;;  %v381_v24 = vld [vmem:[%s1585_s17 + $0x40] sm:$0xff] }
  0x20   : > { %1179 = vmatprep.mubr.msk.f32.mxu1 %vm492_vm1, %v359_v7  ;;  %397 = vperm.xlu0 %1330, %v374_v11   ;;  %v367_v25 = vld [vmem:[%s1575_s10 + $0x60] sm:$0xff]  ;;  %v382_v26 = vld [vmem:[%s1585_s17 + $0x48] sm:$0xff]  ;;  %v383_v29 = vld [vmem:[%s1585_s17 + $0x50] sm:$0xff] }
  0x21   : > { %v368_v28 = vld [vmem:[%s1575_s10 + $0x68] sm:$0xff]  ;;  %v369_v30 = vld [vmem:[%s1575_s10 + $0x70] sm:$0xff]  ;;  %v384_v31 = vld [vmem:[%s1585_s17 + $0x58] sm:$0xff]  ;;  %1200 = vmatpush3.msra.mxu1 %v743_v27 }
  0x22   : > { %v370_v33 = vld [vmem:[%s1575_s10 + $0x78] sm:$0xff]  ;;  %v385_v34 = vld [vmem:[%s1585_s17 + $0x60] sm:$0xff]  ;;  %v386_v35 = vld [vmem:[%s1585_s17 + $0x68] sm:$0xff]  ;;  %1201 = vmatprep.subr.mxu1 %v742_v32  ;;  %s1463_s10 = smov [#allocation3]  }
  0x23   : > { %1180 = vmatmul.mubr.msk.f32.gmra.mxu1 %vm492_vm1, %v360_v10  ;;  %417 = vperm.xlu1 %1331, %v378_v17   ;;  %v387_v38 = vld [vmem:[%s1585_s17 + $0x70] sm:$0xff]  ;;  %v388_v39 = vld [vmem:[%s1585_s17 + $0x78] sm:$0xff]  ;;  %v734_v45 = vld [vmem:[%s1809_s5 + $0x28] sm:$0xff]  ;;  %s342_s17 = scalar_lea.vmem [#allocation3], %s341_s24  ;;  %s1402_s15 = sshll.u32 %s1463_s10, 4  ;;  %s1403_s15 = int_to_ptr.vmem [resolvable:$false] %s1402_s15 }
  0x24   : > { %1182 = vmatprep.mubr.msk.f32.mxu1 %vm492_vm1, %v361_v12  ;;  %412 = vperm.xlu0 %1330, %v377_v15   ;;  %v735_v44 = vld [vmem:[%s1809_s5 + $0x30] sm:$0xff]  ;;  %v733_v46 = vld [vmem:[%s1809_s5 + $0x20] sm:$0xff]  ;;  %v732_v47 = vld [vmem:[%s1809_s5 + $0x18] sm:$0xff]  ;;  %s1004_s25 = sshll.u32 %s342_s17, 4  ;;  %s1404_s18 = scalar_lea.vmem %s1403_s15, 32  ;;  %s1005_s25 = int_to_ptr.vmem [resolvable:$true] %s1004_s25 }
  0x25   : > { %1202 = vmatpush3.msra.mxu1 %v742_v32  ;;  %v731_v48 = vld [vmem:[%s1809_s5 + $0x10] sm:$0xff]  ;;  %v730_v49 = vld [vmem:[%s1809_s5 + $0x8] sm:$0xff]  ;;  %v729_v50 = vld [vmem:[%s1809_s5] sm:$0xff]  ;;  %s1398_s8 = scalar_lea.vmem %s1005_s25, 16  ;;  %p1405_p0 = scmp.lt.s32.totalorder %s1005_s25, %s1403_s15 }
  0x26   : > { %1203 = vmatprep.subr.mxu1 %v741_v36  ;;  %v1681_v55 = vld [vmem:[%s1807_s3] ss:$0 sm:$0xff]  ;;  %p1399_p11 = scmp.ne.s32.totalorder %s1005_s25, %s1398_s8  ;;  %p1406_p1 = scmp.lt.s32.totalorder %s1404_s18, %s1398_s8 }
  0x27   : > { %1183 = vmatmul.mubr.msk.f32.gmra.mxu1 %vm492_vm1, %v362_v14  ;;  %427 = vperm.xlu1 %1331, %v380_v21   ;;  %v1689_v0 = vld [vmem:[%s1808_s4] ss:$0 sm:$0xff] }
  0x28   : > { %1185 = vmatprep.mubr.msk.f32.mxu1 %vm492_vm1, %v363_v16  ;;  %422 = vperm.xlu0 %1330, %v379_v19   ;;  %p1400_p12 = pnand %p1399_p11, %p1552_p5  ;;  %p1407_p2 = por %p1406_p1, %p1405_p0 }
  0x29   : > { %1204 = vmatpush3.msra.mxu1 %v741_v36 }
  0x2a   : > { %1205 = vmatprep.subr.mxu1 %v740_v37  ;;  %p1401_p13 = pneg %p1400_p12 }
  0x2b   : > { %1186 = vmatmul.mubr.msk.f32.gmra.mxu1 %vm492_vm1, %v364_v18  ;;  %437 = vperm.xlu1 %1331, %v382_v26  }
  0x2c   : > { %1188 = vmatprep.mubr.msk.f32.mxu1 %vm492_vm1, %v365_v20  ;;  %432 = vperm.xlu0 %1330, %v381_v24   ;;  %p1408_p3 = pnand %p1407_p2, %p1401_p13 }
  0x2d   : > { %1206 = vmatpush3.msra.mxu1 %v740_v37 }
  0x2e   : > { %1207 = vmatprep.subr.mxu1 %v739_v40 }
  0x2f   : > { %1189 = vmatmul.mubr.msk.f32.gmra.mxu1 %vm492_vm1, %v366_v23  ;;  %447 = vperm.xlu1 %1331, %v384_v31  }
  0x30   : > { %1191 = vmatprep.mubr.msk.f32.mxu1 %vm492_vm1, %v367_v25  ;;  %442 = vperm.xlu0 %1330, %v383_v29  }
  0x31   : > { %1208 = vmatpush3.msra.mxu1 %v739_v40 }
  0x32   : > { %1209 = vmatprep.subr.mxu1 %v738_v41 }
  0x33   : > { %1192 = vmatmul.mubr.msk.f32.gmra.mxu1 %vm492_vm1, %v368_v28  ;;  %457 = vperm.xlu1 %1331, %v386_v35  }
  0x34   : > { %1194 = vmatprep.mubr.msk.f32.mxu1 %vm492_vm1, %v369_v30  ;;  %452 = vperm.xlu0 %1330, %v385_v34  }
  0x35   : > { %1210 = vmatpush3.msra.mxu1 %v738_v41 }
  0x36   : > { %1211 = vmatprep.subr.mxu1 %v737_v42 }
  0x37   : > { %1195 = vmatmul.mubr.msk.f32.gmra.mxu1 %vm492_vm1, %v370_v33  ;;  %467 = vperm.xlu1 %1331, %v388_v39  }
  0x38   : > { %462 = vperm.xlu0 %1330, %v387_v38   ;;  %1212 = vmatpush3.msra.mxu1 %v737_v42 }
  0x39   : > { %1213 = vmatprep.subr.mxu1 %v736_v43 }
  0x3a   : > { %1214 = vmatpush3.msra.mxu1 %v736_v43 }
  0x3b   : > { %1215 = vmatprep.subr.mxu1 %v735_v44 }
  0x3c   : > { %1216 = vmatpush3.msra.mxu1 %v735_v44 }
  0x3d   : > { %1217 = vmatprep.subr.mxu1 %v734_v45 }
  0x3e   : > { %1218 = vmatpush3.msra.mxu1 %v734_v45 }
  0x3f   : > { %1219 = vmatprep.subr.mxu1 %v733_v46 }
  0x40   : > { %1220 = vmatpush3.msra.mxu1 %v733_v46 }
  0x41   : > { %1221 = vmatprep.subr.mxu1 %v732_v47 }
  0x42   : > { %1222 = vmatpush3.msra.mxu1 %v732_v47 }
  0x43   : > { %1223 = vmatprep.subr.mxu1 %v731_v48 }
  0x44   : > { %1224 = vmatpush3.msra.mxu1 %v731_v48 }
  0x45   : > { %1225 = vmatprep.subr.mxu1 %v730_v49 }
  0x46   : > { %1226 = vmatpush3.msra.mxu1 %v730_v49 }
  0x47   : > { %1227 = vmatprep.subr.mxu1 %v729_v50 }
  0x48   : > { %1228 = vmatpush3.msra.mxu1 %v729_v50 }
  0x96   : > { %v403_v51 = vpop.permute.xlu1 %402 }
  0x97   : > { %v393_v52 = vpop.permute.xlu0 %392  ;;  %v478_v6 = vmul.f32 %v1681_v55, %v403_v51 }
  0x98   : > { %v476_v61 = vmul.f32 %v1681_v55, %v393_v52 }
  0x9a   : > { %v408_v53 = vpop.permute.xlu1 %407 }
  0x9b   : > { %v398_v54 = vpop.permute.xlu0 %397  ;;  %v479_v62 = vmul.f32 %v1681_v55, %v408_v53 }
  0x9c   : > { %v477_v58 = vmul.f32 %v1681_v55, %v398_v54 }
  0x9e   : > { %v418_v56 = vpop.permute.xlu1 %417 }
  0x9f   : > { %v413_v57 = vpop.permute.xlu0 %412  ;;  %v481_v11 = vmul.f32 %v1681_v55, %v418_v56 }
  0xa0   : > { %v480_v16 = vmul.f32 %v1681_v55, %v413_v57 }
  0xa2   : > { %v428_v59 = vpop.permute.xlu1 %427 }
  0xa3   : > { %v423_v1 = vpop.permute.xlu0 %422  ;;  %v483_v20 = vmul.f32 %v1681_v55, %v428_v59 }
  0xa4   : > { %v482_v25 = vmul.f32 %v1681_v55, %v423_v1 }
  0xa6   : > { %v438_v9 = vpop.permute.xlu1 %437 }
  0xa7   : > { %v433_v13 = vpop.permute.xlu0 %432  ;;  %v485_v30 = vmul.f32 %v1681_v55, %v438_v9 }
  0xa8   : > { %v484_v34 = vmul.f32 %v1681_v55, %v433_v13 }
  0xaa   : > { %v448_v22 = vpop.permute.xlu1 %447 }
  0xab   : > { %v443_v28 = vpop.permute.xlu0 %442  ;;  %v487_v39 = vmul.f32 %v1681_v55, %v448_v22 }
  0xac   : > { %v486_v46 = vmul.f32 %v1681_v55, %v443_v28 }
  0xae   : > { %v458_v37 = vpop.permute.xlu1 %457 }
  0xaf   : > { %v453_v42 = vpop.permute.xlu0 %452  ;;  %v489_v50 = vmul.f32 %v1681_v55, %v458_v37 }
  0xb2   : > { %v468_v53 = vpop.permute.xlu1 %467 }
  0xdb   : > { %v1175_v60 = vpop.f32.mrf.mxu1 }
  0xdc   : > { %v617_v63 = vadd.f32 %v1175_v60, %v477_v58  ;;  %v488_v58 = vmul.f32 %v1681_v55, %v453_v42 }
  0xdd   : > { %v611_v2 = vpop.f32.mrf.mxu1 }
  0xde   : > { %v612_v3 = vadd.f32 %v611_v2, %v476_v61  ;;  %v698_v4 = vadd.f32 %v1689_v0, %v617_v63  ;;  %v463_v61 = vpop.permute.xlu0 %462  ;;  %v491_v63 = vmul.f32 %v1681_v55, %v468_v53 }
  0xdf   : > { %v1178_v5 = vpop.f32.mrf.mxu1 }
  0xe0   : > { %v697_v7 = vadd.f32 %v1689_v0, %v612_v3  ;;  %v627_v8 = vadd.f32 %v1178_v5, %v479_v62 }
  0xe1   : > { %v621_v10 = vpop.f32.mrf.mxu1 }
  0xe2   : > { %1332 = vtanh.f32 %v697_v7  ;;  %v622_v12 = vadd.f32 %v621_v10, %v478_v6  ;;  %v700_v14 = vadd.f32 %v1689_v0, %v627_v8  ;;  %v490_v6 = vmul.f32 %v1681_v55, %v463_v61 }
  0xe3   : > { %1334 = vtanh.f32 %v698_v4  ;;  %v1181_v15 = vpop.f32.mrf.mxu1 }
  0xe4   : > { %v699_v17 = vadd.f32 %v1689_v0, %v622_v12  ;;  %v637_v18 = vadd.f32 %v1181_v15, %v481_v11 }
  0xe5   : > { %v631_v19 = vpop.f32.mrf.mxu1 }
  0xe6   : > { %1336 = vtanh.f32 %v699_v17  ;;  %v632_v21 = vadd.f32 %v631_v19, %v480_v16  ;;  %v702_v23 = vadd.f32 %v1689_v0, %v637_v18 }
  0xe7   : > { %1338 = vtanh.f32 %v700_v14  ;;  %v1184_v24 = vpop.f32.mrf.mxu1 }
  0xe8   : > { %v701_v26 = vadd.f32 %v1689_v0, %v632_v21  ;;  %v647_v27 = vadd.f32 %v1184_v24, %v483_v20 }
  0xe9   : > { %v641_v29 = vpop.f32.mrf.mxu1 }
  0xea   : > { %1340 = vtanh.f32 %v701_v26  ;;  %v642_v31 = vadd.f32 %v641_v29, %v482_v25  ;;  %v704_v32 = vadd.f32 %v1689_v0, %v647_v27 }
  0xeb   : > { %1342 = vtanh.f32 %v702_v23  ;;  %v1187_v33 = vpop.f32.mrf.mxu1 }
  0xec   : > { %v703_v35 = vadd.f32 %v1689_v0, %v642_v31  ;;  %v657_v36 = vadd.f32 %v1187_v33, %v485_v30 }
  0xed   : > { %v651_v38 = vpop.f32.mrf.mxu1 }
  0xee   : > { %1344 = vtanh.f32 %v703_v35  ;;  %v652_v40 = vadd.f32 %v651_v38, %v484_v34  ;;  %v706_v43 = vadd.f32 %v1689_v0, %v657_v36  ;;  %v1731_v36 = vld [vmem:[%s1810_s6] ss:$0 sm:$0xff] }
  0xef   : > { %v1333_v41 = vpop.eup %1332  ;;  %1346 = vtanh.f32 %v704_v32  ;;  %v1190_v44 = vpop.f32.mrf.mxu1 }
  0xf0   : > { %v1335_v45 = vpop.eup %1334  ;;  %v705_v47 = vadd.f32 %v1689_v0, %v652_v40  ;;  %v667_v48 = vadd.f32 %v1190_v44, %v487_v39  ;;  %1229 = vmatprep.mubr.f32.mxu1 %v1333_v41 }
  0xf1   : > { %v661_v49 = vpop.f32.mrf.mxu1  ;;  %1230 = vmatmul.mubr.f32.vlgmr.msra.gmra.mxu1 %v1335_v45 }
  0xf2   : > { %1348 = vtanh.f32 %v705_v47  ;;  %v662_v51 = vadd.f32 %v661_v49, %v486_v46  ;;  %v708_v54 = vadd.f32 %v1689_v0, %v667_v48 }
  0xf3   : > { %v1337_v52 = vpop.eup %1336  ;;  %1350 = vtanh.f32 %v706_v43  ;;  %v1193_v56 = vpop.f32.mrf.mxu1 }
  0xf4   : > { %v1339_v57 = vpop.eup %1338  ;;  %v707_v59 = vadd.f32 %v1689_v0, %v662_v51  ;;  %v677_v60 = vadd.f32 %v1193_v56, %v489_v50  ;;  %1232 = vmatprep.mubr.f32.mxu1 %v1337_v52 }
  0xf5   : > { %v671_v62 = vpop.f32.mrf.mxu1  ;;  %1233 = vmatmul.mubr.f32.gmra.mxu1 %v1339_v57 }
  0xf6   : > { %1352 = vtanh.f32 %v707_v59  ;;  %v672_v1 = vadd.f32 %v671_v62, %v488_v58  ;;  %v710_v3 = vadd.f32 %v1689_v0, %v677_v60 }
  0xf7   : > { %v1341_v2 = vpop.eup %1340  ;;  %1354 = vtanh.f32 %v708_v54  ;;  %v1196_v4 = vpop.f32.mrf.mxu1 }
  0xf8   : > { %v1343_v5 = vpop.eup %1342  ;;  %v709_v7 = vadd.f32 %v1689_v0, %v672_v1  ;;  %v687_v8 = vadd.f32 %v1196_v4, %v491_v63  ;;  %1235 = vmatprep.mubr.f32.mxu1 %v1341_v2 }
  0xf9   : > { %v681_v9 = vpop.f32.mrf.mxu1  ;;  %1236 = vmatmul.mubr.f32.gmra.mxu1 %v1343_v5 }
  0xfa   : > { %1356 = vtanh.f32 %v709_v7  ;;  %v682_v10 = vadd.f32 %v681_v9, %v490_v6  ;;  %v712_v12 = vadd.f32 %v1689_v0, %v687_v8  ;;  %v913_v9 = vld [vmem:[%s1811_s7] sm:$0x1] }
  0xfb   : > { %v1345_v11 = vpop.eup %1344  ;;  %1358 = vtanh.f32 %v710_v3 }
  0xfc   : > { %v1347_v13 = vpop.eup %1346  ;;  %v711_v14 = vadd.f32 %v1689_v0, %v682_v10  ;;  %1238 = vmatprep.mubr.f32.mxu1 %v1345_v11  ;;  %v1461_v0 = vmov 0.0   ;;  %v915_v10 = vstv %s914_s23 }
  0xfd   : > { %1239 = vmatmul.mubr.f32.gmra.mxu1 %v1347_v13  ;;  %1253 = vmatprep.subr.mxu0 %v1461_v0 }
  0xfe   : > { %1360 = vtanh.f32 %v711_v14  ;;  %1285 = vmatprep.mubr.msk.f32.mxu0 %vm1462_vm2, %v1461_v0 }
  0xff   : > { %v1349_v15 = vpop.eup %1348  ;;  %1362 = vtanh.f32 %v712_v12 }
 0x100   : > { %v1351_v55 = vpop.eup %1350  ;;  %1241 = vmatprep.mubr.f32.mxu1 %v1349_v15 }
 0x101   : > { %1242 = vmatmul.mubr.f32.gmra.mxu1 %v1351_v55 }
 0x103   : > { %v1353_v16 = vpop.eup %1352 }
 0x104   : > { %v1355_v17 = vpop.eup %1354  ;;  %1244 = vmatprep.mubr.f32.mxu1 %v1353_v16 }
 0x105   : > { %1245 = vmatmul.mubr.f32.gmra.mxu1 %v1355_v17 }
 0x107   : > { %v1357_v18 = vpop.eup %1356 }
 0x108   : > { %v1359_v19 = vpop.eup %1358  ;;  %1247 = vmatprep.mubr.f32.mxu1 %v1357_v18 }
 0x109   : > { %1248 = vmatmul.mubr.f32.gmra.mxu1 %v1359_v19 }
 0x10b   : > { %v1361_v20 = vpop.eup %1360 }
 0x10c   : > { %v1363_v21 = vpop.eup %1362  ;;  %1250 = vmatprep.mubr.f32.mxu1 %v1361_v20 }
 0x10d   : > { %1251 = vmatmul.mubr.f32.gmra.mxu1 %v1363_v21 }
 0x1b1   : > { %v1722_v22 = vpop.f32.mrf.mxu1 }
 0x1b2   : > { %v824_v1 = vadd.f32 %v1722_v22, %v1731_v36 }
 0x1b3   : > { %v1724_v23 = vpop.f32.mrf.mxu1 }
 0x1b4   : > { %v819_v3 = vadd.f32 %v1731_v36, %v1724_v23 }
 0x1b5   : > { %v1234_v24 = vpop.f32.mrf.mxu1 }
 0x1b6   : > { %v834_v60 = vadd.f32 %v1234_v24, %v1731_v36 }
 0x1b7   : > { %v1726_v25 = vpop.f32.mrf.mxu1 }
 0x1b8   : > { %v829_v62 = vadd.f32 %v1731_v36, %v1726_v25 }
 0x1b9   : > { %v1237_v26 = vpop.f32.mrf.mxu1 }
 0x1ba   : > { %v844_v56 = vadd.f32 %v1237_v26, %v1731_v36 }
 0x1bb   : > { %v838_v27 = vpop.f32.mrf.mxu1 }
 0x1bc   : > { %v839_v58 = vadd.f32 %v1731_v36, %v838_v27 }
 0x1bd   : > { %v1240_v28 = vpop.f32.mrf.mxu1 }
 0x1be   : > { %v854_v51 = vadd.f32 %v1240_v28, %v1731_v36 }
 0x1bf   : > { %v848_v29 = vpop.f32.mrf.mxu1 }
 0x1c0   : > { %v849_v53 = vadd.f32 %v1731_v36, %v848_v29 }
 0x1c1   : > { %v1243_v30 = vpop.f32.mrf.mxu1 }
 0x1c2   : > { %v864_v47 = vadd.f32 %v1243_v30, %v1731_v36 }
 0x1c3   : > { %v858_v31 = vpop.f32.mrf.mxu1 }
 0x1c4   : > { %v859_v49 = vadd.f32 %v1731_v36, %v858_v31 }
 0x1c5   : > { %v1246_v32 = vpop.f32.mrf.mxu1 }
 0x1c6   : > { %v874_v43 = vadd.f32 %v1246_v32, %v1731_v36 }
 0x1c7   : > { %v868_v33 = vpop.f32.mrf.mxu1 }
 0x1c8   : > { %v869_v45 = vadd.f32 %v1731_v36, %v868_v33 }
 0x1c9   : > { %v1249_v34 = vpop.f32.mrf.mxu1 }
 0x1ca   : > { %v884_v41 = vadd.f32 %v1249_v34, %v1731_v36 }
 0x1cb   : > { %v878_v35 = vpop.f32.mrf.mxu1 }
 0x1cc   : > { %v879_v42 = vadd.f32 %v1731_v36, %v878_v35 }
 0x1cd   : > { %v1252_v37 = vpop.f32.mrf.mxu1 }
 0x1ce   : > { %v894_v38 = vadd.f32 %v1252_v37, %v1731_v36 }
 0x1cf   : > { %v888_v39 = vpop.f32.mrf.mxu1 }
 0x1d0   : > { %1364 = vtanh.f32 %v894_v38  ;;  %v889_v40 = vadd.f32 %v1731_v36, %v888_v39 }
 0x1d2   : > { %1366 = vtanh.f32 %v889_v40 }
 0x1d3   : > { %1368 = vtanh.f32 %v884_v41 }
 0x1d4   : > { %1370 = vtanh.f32 %v879_v42 }
 0x1d5   : > { %1372 = vtanh.f32 %v874_v43 }
 0x1d6   : > { %1374 = vtanh.f32 %v869_v45 }
 0x1d7   : > { %1376 = vtanh.f32 %v864_v47 }
 0x1d8   : > { %1378 = vtanh.f32 %v859_v49 }
 0x1d9   : > { %1380 = vtanh.f32 %v854_v51 }
 0x1da   : > { %1382 = vtanh.f32 %v849_v53 }
 0x1db   : > { %1384 = vtanh.f32 %v844_v56 }
 0x1dc   : > { %1386 = vtanh.f32 %v839_v58 }
 0x1dd   : > { %v1365_v44 = vpop.eup %1364  ;;  %1388 = vtanh.f32 %v834_v60 }
 0x1de   : > { %1254 = vmatpush3.xpose.msra.mxu0 %v1365_v44  ;;  %1390 = vtanh.f32 %v829_v62 }
 0x1df   : > { %1255 = vmatprep.subr.mxu0 %v1461_v0  ;;  %v1367_v46 = vpop.eup %1366  ;;  %1392 = vtanh.f32 %v824_v1 }
 0x1e0   : > { %v1369_v48 = vpop.eup %1368  ;;  %1394 = vtanh.f32 %v819_v3 }
 0x1e1   : > { %v1371_v50 = vpop.eup %1370 }
 0x1e2   : > { %1256 = vmatpush3.xpose.msra.mxu0 %v1367_v46  ;;  %v1373_v52 = vpop.eup %1372 }
 0x1e3   : > { %1257 = vmatprep.subr.mxu0 %v1461_v0  ;;  %v1375_v54 = vpop.eup %1374 }
 0x1e4   : > { %v1377_v57 = vpop.eup %1376 }
 0x1e5   : > { %v1379_v59 = vpop.eup %1378 }
 0x1e6   : > { %1258 = vmatpush3.xpose.msra.mxu0 %v1369_v48  ;;  %v1381_v61 = vpop.eup %1380 }
 0x1e7   : > { %1259 = vmatprep.subr.mxu0 %v1461_v0  ;;  %v1383_v63 = vpop.eup %1382 }
 0x1e8   : > { %v1385_v2 = vpop.eup %1384 }
 0x1e9   : > { %v1387_v4 = vpop.eup %1386 }
 0x1ea   : > { %1260 = vmatpush3.xpose.msra.mxu0 %v1371_v50  ;;  %v1389_v5 = vpop.eup %1388 }
 0x1eb   : > { %1261 = vmatprep.subr.mxu0 %v1461_v0  ;;  %v1391_v6 = vpop.eup %1390 }
 0x1ec   : > { %v1393_v7 = vpop.eup %1392 }
 0x1ed   : > { %v1395_v8 = vpop.eup %1394 }
 0x1ee   : > { %1262 = vmatpush3.xpose.msra.mxu0 %v1373_v52 }
 0x1ef   : > { %1263 = vmatprep.subr.mxu0 %v1461_v0 }
 0x1f2   : > { %1264 = vmatpush3.xpose.msra.mxu0 %v1375_v54 }
 0x1f3   : > { %1265 = vmatprep.subr.mxu0 %v1461_v0 }
 0x1f6   : > { %1266 = vmatpush3.xpose.msra.mxu0 %v1377_v57 }
 0x1f7   : > { %1267 = vmatprep.subr.mxu0 %v1461_v0 }
 0x1fa   : > { %1268 = vmatpush3.xpose.msra.mxu0 %v1379_v59 }
 0x1fb   : > { %1269 = vmatprep.subr.mxu0 %v1461_v0 }
 0x1fe   : > { %1270 = vmatpush3.xpose.msra.mxu0 %v1381_v61 }
 0x1ff   : > { %1271 = vmatprep.subr.mxu0 %v1461_v0 }
 0x202   : > { %1272 = vmatpush3.xpose.msra.mxu0 %v1383_v63 }
 0x203   : > { %1273 = vmatprep.subr.mxu0 %v1461_v0 }
 0x206   : > { %1274 = vmatpush3.xpose.msra.mxu0 %v1385_v2 }
 0x207   : > { %1275 = vmatprep.subr.mxu0 %v1461_v0 }
 0x20a   : > { %1276 = vmatpush3.xpose.msra.mxu0 %v1387_v4 }
 0x20b   : > { %1277 = vmatprep.subr.mxu0 %v1461_v0 }
 0x20e   : > { %1278 = vmatpush3.xpose.msra.mxu0 %v1389_v5 }
 0x20f   : > { %1279 = vmatprep.subr.mxu0 %v1461_v0 }
 0x212   : > { %1280 = vmatpush3.xpose.msra.mxu0 %v1391_v6 }
 0x213   : > { %1281 = vmatprep.subr.mxu0 %v1461_v0 }
 0x216   : > { %1282 = vmatpush3.xpose.msra.mxu0 %v1393_v7 }
 0x217   : > { %1283 = vmatprep.subr.mxu0 %v1461_v0 }
 0x21a   : > { %1284 = vmatpush3.xpose.msra.mxu0 %v1395_v8 }
 0x21d   : > { %1286 = vmatmul.mubr.f32.vlgmr.msra.gmra.mxu0 %v913_v9 }
 0x2dd   : > { %v982_v11 = vpop.f32.mrf.mxu0 }
 0x2de   : > { %v983_v12 = vadd.f32 %v982_v11, %v915_v10 }
 0x2df   : > { %v1287_v13 = vpop.f32.mrf.mxu0 }
 0x2e0   : > { %v986_v14 = vmul.f32 0.04, %v983_v12 }
 0x2e2   : > { %1396 = vtanh.f32 %v986_v14 }
 0x2ef   : > { %v1397_v15 = vpop.eup %1396 }
 0x2f0   : > { %v988_v55 = vadd.f32 1.0, %v1397_v15 }
 0x2f2   : > { %v989_v16 = vmul.f32 25.0, %v988_v55 }
 0x2f4   : > { %990 = vst [vmem:[%s342_s17] sm:$0x1] %v989_v16 }
 0x2f5   : > { %1411 = shalt.err (!%p1408_p3)
}
 0x2f6   : > { %s1412_s22 = scalar_lea.hbm %s1002_s29, 16  ;;  %s1416_s24 = scalar_lea.hbm %s1813_s9, 32 }
 0x2f7   : > { %p1413_p4 = scmp.ne.s32.totalorder %s1002_s29, %s1412_s22  ;;  %p1417_p9 = scmp.lt.s32.totalorder %s1002_s29, %s1813_s9 }
 0x2f8   : > { %p1418_p10 = scmp.lt.s32.totalorder %s1416_s24, %s1412_s22 }
 0x2f9   : > { %p1414_p7 = pnand %p1413_p4, %p1552_p5 }
 0x2fa   : > { %p1419_p11 = por %p1418_p10, %p1417_p9 }
 0x2fb   : > { %p1415_p8 = pneg %p1414_p7 }
 0x2fd   : > { %p1420_p12 = pnand %p1419_p11, %p1415_p8 }
 0x2ff   : > { %1423 = shalt.err (!%p1420_p12)
}
 0x300   : > { %1288 = dma.vmem_to_hbm [thread:$0]  (%p1552_p5), %s1005_s25, 16, %s1002_s29, %s992_s30  }
 0x301 PF: > { %p1294_p13 = scmp.ge.s32.totalorder %s1458_s14, 2  ;;  %s1016_s28 = sand.u32 1, %s1446_s11  }
 0x302   : > { %s1017_s8 = scalar_lea.sflag [#allocation4], %s1016_s28 }
 0x303   : > { %p1291_p0 = pnand %p1294_p13, %p1556_p6 }
 0x305   : > { %p1292_p1 = pneg %p1291_p0 }
 0x307   : > { %1441 = dma.done.wait (%p1292_p1), %s1017_s8, 16  }
 0x308   : > { %1443 = vsyncadd (%p1292_p1), %s1017_s8, 4294967280  ;;  %p20_p2 = scmp.ge.s32.totalorder %s1540_s16, 4   ;;  %s1816_s11 = smov %s1450_s12 }
 0x309   : > { %s1817_s12 = smov %s1454_s13  ;;  %s1818_s13 = smov %s1550_s19 }
 0x30a   : > { %s1819_s14 = smov %s1540_s16  ;;  %22 = sbr.rel (!%p20_p2) target bundleno = 5 (0x5), region = 94 }
 0x30f   :  { %1021 = vsyncpa [#allocation4], 1 }
 0x310   :  { %1023 = vsyncpa [#allocation4 + $0x1], 1 }

</bundles_post_ra>
